<compile_context>
chip_gen: v6e
topology: v6e:2x2x1
jax: 0.10.0
libtpu: 0.0.40
codegen_flags: <defaults>
</compile_context>

<pallas_src>
import functools

import jax
import jax.numpy as jnp
from jax.experimental import pallas as pl
from jax.experimental.pallas import tpu as pltpu


_LANE = 128
_ROW_ALIGN = 16          # bf16 packs 16 rows per packed sublane group
_TARGET_TILES = 2        # one tile per v7x TensorCore; near-free extra step on v5e/v6e
_MAX_BATCH_TILE = 512    # VMEM cap for very large batches
_NEG_SENTINEL = -1e30    # f32-safe; would be -inf in bf16 (harmless: those cols are sliced off)


def _round_up(n, m):
    return ((n + m - 1) // m) * m


def _make_fused_mlp_kernel(num_hidden):
    """Fused kernel; refs = (x, w1, b1, ..., wH, bH, w_out, b_out, o)."""

    def kernel(*refs):
        x_ref = refs[0]
        o_ref = refs[-1]
        wb = refs[1:-1]

        h = x_ref[...]                        # bf16, fed straight to the MXU
        # Hidden layers: relu(h @ W + b). Dropout is identity (eval-mode semantics).
        # TODO(synk): training-mode stochastic dropout would need pltpu.prng_seed /
        #             pltpu.prng_random_bits in-kernel.
        for li in range(num_hidden):
            w = wb[2 * li][...]               # bf16 weights -> MXU
            b = wb[2 * li + 1][...]           # f32 bias, (1, out) broadcasts over rows
            y = jnp.dot(h, w, preferred_element_type=jnp.float32)
            h = jnp.maximum(y + b, 0.0).astype(jnp.bfloat16)

        w_out = wb[2 * num_hidden][...]
        b_out = wb[2 * num_hidden + 1][...]
        # Padded logit lanes carry b_out = -1e30 (and zero weight columns), so they vanish
        # from the softmax normalizer without any in-kernel masking.
        logits = jnp.dot(h, w_out, preferred_element_type=jnp.float32) + b_out

        m = jnp.max(logits, axis=1, keepdims=True)
        z = logits - m
        lse = jnp.log(jnp.sum(jnp.exp(z), axis=1, keepdims=True))
        o_ref[...] = (z - lse).astype(o_ref.dtype)

    return kernel


def init_params(key, input_size, output_size, hidden_layers):
    """Init mirroring nn.Linear's default (uniform +/- 1/sqrt(fan_in)).

    Weights are stored (in_features, out_features) in bf16 (MXU-native input type);
    biases stay f32 since the epilogue math runs in f32. The output layer is pre-padded
    ONCE here (zero weight cols, -1e30 bias cols) so the forward pass does no padding.
    NOTE: bf16 weights quantize vs. the f32 PyTorch module; keep f32 + per-tile cast if
    bit-faithfulness to PyTorch matters."""
    sizes = [input_size] + list(hidden_layers)
    params = {"hidden": []}
    for h1, h2 in zip(sizes[:-1], sizes[1:]):
        key, kw, kb = jax.random.split(key, 3)
        bound = 1.0 / (h1 ** 0.5)
        w = jax.random.uniform(kw, (h1, h2), jnp.float32, -bound, bound)
        b = jax.random.uniform(kb, (1, h2), jnp.float32, -bound, bound)
        params["hidden"].append((w.astype(jnp.bfloat16), b))

    key, kw, kb = jax.random.split(key, 3)
    fan_in = sizes[-1]
    bound = 1.0 / (fan_in ** 0.5)
    w = jax.random.uniform(kw, (fan_in, output_size), jnp.float32, -bound, bound)
    b = jax.random.uniform(kb, (1, output_size), jnp.float32, -bound, bound)
    out_pad = _round_up(output_size, _LANE)
    w_p = jnp.pad(w, ((0, 0), (0, out_pad - output_size))).astype(jnp.bfloat16)
    b_p = jnp.pad(b, ((0, 0), (0, out_pad - output_size)),
                  constant_values=_NEG_SENTINEL)
    params["out"] = (w_p, b_p)
    return params


@functools.partial(jax.jit, static_argnums=(2,))
def network_forward(x, params, out_size):
    batch, in_size = x.shape
    hidden = params["hidden"]
    w_out_p, b_out_p = params["out"]          # pre-padded + pre-cast at init time
    out_pad = w_out_p.shape[1]

    # Cast the input once; the MXU consumes bf16 directly (halves the batch-scaled DMA).
    x_bf = x.astype(jnp.bfloat16)

    # At most _TARGET_TILES grid steps, 16-row aligned, capped for VMEM.
    bt = min(_round_up(pl.cdiv(batch, _TARGET_TILES), _ROW_ALIGN), _MAX_BATCH_TILE)
    padded_batch = _round_up(batch, bt)
    if padded_batch != batch:
        x_bf = jnp.pad(x_bf, ((0, padded_batch - batch), (0, 0)))
    grid = (padded_batch // bt,)

    args = [x_bf]
    in_specs = [pl.BlockSpec((bt, in_size), lambda i: (i, 0))]
    # Weights/biases: full-array blocks with constant index_maps -> DMA'd once, resident
    # across all batch tiles. (Lambdas capture nothing loop-dependent — keep it that way.)
    # TODO(synk): for large hidden widths on v7x (64 MiB VMEM) add
    #             pipeline_mode=pl.Buffered(1) here and set vmem_limit_bytes explicitly.
    for (w, b) in hidden:
        args += [w, b]
        in_specs += [pl.BlockSpec(w.shape, lambda i: (0, 0)),
                     pl.BlockSpec(b.shape, lambda i: (0, 0))]
    args += [w_out_p, b_out_p]
    in_specs += [pl.BlockSpec(w_out_p.shape, lambda i: (0, 0)),
                 pl.BlockSpec(b_out_p.shape, lambda i: (0, 0))]

    kernel = _make_fused_mlp_kernel(len(hidden))
    out = pl.pallas_call(
        kernel,
        out_shape=jax.ShapeDtypeStruct((padded_batch, out_pad), jnp.float32),
        grid=grid,
        in_specs=in_specs,
        out_specs=pl.BlockSpec((bt, out_pad), lambda i: (i, 0)),
        compiler_params=pltpu.CompilerParams(
            dimension_semantics=("parallel",)),
    )(*args)

    if padded_batch != batch or out_pad != out_size:
        # NOTE: this slice is an extra HBM copy of the output; callers that can consume the
        # lane-padded array directly should skip it.
        out = out[:batch, :out_size]
    return out


def _reference_forward(x, params, out_size):
    """Pure-JAX reference mirroring the kernel's dtype handling (bf16 matmul, f32 epilogue)."""
    h = x.astype(jnp.bfloat16)
    for (w, b) in params["hidden"]:
        y = jnp.dot(h, w, preferred_element_type=jnp.float32) + b
        h = jnp.maximum(y, 0.0).astype(jnp.bfloat16)
    w, b = params["out"]
    logits = (jnp.dot(h, w, preferred_element_type=jnp.float32) + b)[:, :out_size]
    return jax.nn.log_softmax(logits, axis=1)


if __name__ == "__main__":
    batch = 256            # -> two 128-row tiles (one per v7x TC); tiny extra step on v5e/v6e
    input_size = 32
    hidden_layers = [64, 32]
    output_size = 16

    key = jax.random.PRNGKey(0)
    kx, kp = jax.random.split(key)
    x = jax.random.normal(kx, (batch, input_size), jnp.float32)
    params = init_params(kp, input_size, output_size, hidden_layers)

    out = jax.block_until_ready(network_forward(x, params, output_size))

    ref = _reference_forward(x, params, output_size)
    assert out.shape == (batch, output_size)
    assert bool(jnp.allclose(out, ref, atol=2e-3, rtol=2e-3)), "mismatch vs reference"
    # rows must be valid log-probabilities
    assert bool(jnp.allclose(jnp.sum(jnp.exp(out), axis=1), 1.0, atol=1e-3)), "bad normalizer"

    print("KERNEL_OK")
</pallas_src>

<mosaic_0001>
module attributes {stable_mosaic.version = 11 : i64} {
  func.func @kernel(%arg0: i32, %arg1: memref<128x32xbf16, #tpu.memory_space<vmem>>, %arg2: memref<32x64xbf16, #tpu.memory_space<vmem>>, %arg3: memref<1x64xf32, #tpu.memory_space<vmem>>, %arg4: memref<64x32xbf16, #tpu.memory_space<vmem>>, %arg5: memref<1x32xf32, #tpu.memory_space<vmem>>, %arg6: memref<32x128xbf16, #tpu.memory_space<vmem>>, %arg7: memref<1x128xf32, #tpu.memory_space<vmem>>, %arg8: memref<128x128xf32, #tpu.memory_space<vmem>>) attributes {dimension_semantics = [#tpu.dimension_semantics<parallel>], iteration_bounds = array<i64: 2>, scalar_prefetch = 0 : i64, scratch_operands = 0 : i64, tpu.core_type = #tpu.core_type<tc>, window_params = [{transform_indices = @transform_0, window_bounds = array<i64: 128, 32>}, {pipeline_mode = #tpu.pipeline_mode<synchronous>, transform_indices = @transform_1, window_bounds = array<i64: 32, 64>}, {pipeline_mode = #tpu.pipeline_mode<synchronous>, transform_indices = @transform_2, window_bounds = array<i64: 1, 64>}, {pipeline_mode = #tpu.pipeline_mode<synchronous>, transform_indices = @transform_3, window_bounds = array<i64: 64, 32>}, {pipeline_mode = #tpu.pipeline_mode<synchronous>, transform_indices = @transform_4, window_bounds = array<i64: 1, 32>}, {pipeline_mode = #tpu.pipeline_mode<synchronous>, transform_indices = @transform_5, window_bounds = array<i64: 32, 128>}, {pipeline_mode = #tpu.pipeline_mode<synchronous>, transform_indices = @transform_6, window_bounds = array<i64: 1, 128>}, {transform_indices = @transform_7, window_bounds = array<i64: 128, 128>}]} {
    %c0 = arith.constant 0 : index
    %c0_0 = arith.constant 0 : index
    %0 = vector.load %arg1[%c0, %c0_0] : memref<128x32xbf16, #tpu.memory_space<vmem>>, vector<128x32xbf16>
    %c0_1 = arith.constant 0 : index
    %c0_2 = arith.constant 0 : index
    %1 = vector.load %arg2[%c0_1, %c0_2] : memref<32x64xbf16, #tpu.memory_space<vmem>>, vector<32x64xbf16>
    %c0_3 = arith.constant 0 : index
    %c0_4 = arith.constant 0 : index
    %2 = vector.load %arg3[%c0_3, %c0_4] : memref<1x64xf32, #tpu.memory_space<vmem>>, vector<1x64xf32>
    %cst = arith.constant dense<0.000000e+00> : vector<128x64xf32>
    %3 = tpu.matmul %0, %1, %cst {dimension_numbers = #tpu.dot_dimension_numbers<[1], [0], [0], [1], [0, 0, 1, 1], [], []>} : vector<128x32xbf16>, vector<32x64xbf16>, vector<128x64xf32> -> vector<128x64xf32>
    %4 = vector.broadcast %2 : vector<1x64xf32> to vector<128x64xf32>
    %5 = arith.addf %3, %4 : vector<128x64xf32>
    %cst_5 = arith.constant 0.000000e+00 : f32
    %6 = vector.broadcast %cst_5 : f32 to vector<128x64xf32>
    %7 = arith.maximumf %5, %6 : vector<128x64xf32>
    %8 = arith.truncf %7 : vector<128x64xf32> to vector<128x64xbf16>
    %c0_6 = arith.constant 0 : index
    %c0_7 = arith.constant 0 : index
    %9 = vector.load %arg4[%c0_6, %c0_7] : memref<64x32xbf16, #tpu.memory_space<vmem>>, vector<64x32xbf16>
    %c0_8 = arith.constant 0 : index
    %c0_9 = arith.constant 0 : index
    %10 = vector.load %arg5[%c0_8, %c0_9] : memref<1x32xf32, #tpu.memory_space<vmem>>, vector<1x32xf32>
    %cst_10 = arith.constant dense<0.000000e+00> : vector<128x32xf32>
    %11 = tpu.matmul %8, %9, %cst_10 {dimension_numbers = #tpu.dot_dimension_numbers<[1], [0], [0], [1], [0, 0, 1, 1], [], []>} : vector<128x64xbf16>, vector<64x32xbf16>, vector<128x32xf32> -> vector<128x32xf32>
    %12 = vector.broadcast %10 : vector<1x32xf32> to vector<128x32xf32>
    %13 = arith.addf %11, %12 : vector<128x32xf32>
    %cst_11 = arith.constant 0.000000e+00 : f32
    %14 = vector.broadcast %cst_11 : f32 to vector<128x32xf32>
    %15 = arith.maximumf %13, %14 : vector<128x32xf32>
    %16 = arith.truncf %15 : vector<128x32xf32> to vector<128x32xbf16>
    %c0_12 = arith.constant 0 : index
    %c0_13 = arith.constant 0 : index
    %17 = vector.load %arg6[%c0_12, %c0_13] : memref<32x128xbf16, #tpu.memory_space<vmem>>, vector<32x128xbf16>
    %c0_14 = arith.constant 0 : index
    %c0_15 = arith.constant 0 : index
    %18 = vector.load %arg7[%c0_14, %c0_15] : memref<1x128xf32, #tpu.memory_space<vmem>>, vector<1x128xf32>
    %cst_16 = arith.constant dense<0.000000e+00> : vector<128x128xf32>
    %19 = tpu.matmul %16, %17, %cst_16 {dimension_numbers = #tpu.dot_dimension_numbers<[1], [0], [0], [1], [0, 0, 1, 1], [], []>} : vector<128x32xbf16>, vector<32x128xbf16>, vector<128x128xf32> -> vector<128x128xf32>
    %20 = vector.broadcast %18 : vector<1x128xf32> to vector<128x128xf32>
    %21 = arith.addf %19, %20 : vector<128x128xf32>
    %cst_17 = arith.constant dense<0xFF800000> : vector<128xf32>
    %22 = vector.multi_reduction <maximumf>, %21, %cst_17 [1] : vector<128x128xf32> to vector<128xf32>
    %23 = vector.shape_cast %22 : vector<128xf32> to vector<128x1xf32>
    %24 = vector.broadcast %23 : vector<128x1xf32> to vector<128x128xf32>
    %25 = arith.subf %21, %24 : vector<128x128xf32>
    %26 = math.exp %25 : vector<128x128xf32>
    %cst_18 = arith.constant dense<0.000000e+00> : vector<128xf32>
    %27 = vector.multi_reduction <add>, %26, %cst_18 [1] : vector<128x128xf32> to vector<128xf32>
    %28 = vector.shape_cast %27 : vector<128xf32> to vector<128x1xf32>
    %29 = math.log %28 : vector<128x1xf32>
    %30 = vector.broadcast %29 : vector<128x1xf32> to vector<128x128xf32>
    %31 = arith.subf %25, %30 : vector<128x128xf32>
    %c0_19 = arith.constant 0 : index
    %c0_20 = arith.constant 0 : index
    %32 = vector.load %arg8[%c0_19, %c0_20] : memref<128x128xf32, #tpu.memory_space<vmem>>, vector<128x128xf32>
    tpu.vector_store %arg8[%c0_19, %c0_20], %31 {strides = array<i32>} : memref<128x128xf32, #tpu.memory_space<vmem>>, vector<128x128xf32>,
    return
  }
  func.func @transform_0(%arg0: i32) -> (i32, i32) {
    %c0_i32 = arith.constant 0 : i32
    %c0_i32_0 = arith.constant 0 : i32
    return %arg0, %c0_i32 : i32, i32
  }
  func.func @transform_1(%arg0: i32) -> (i32, i32) {
    %c0_i32 = arith.constant 0 : i32
    %c0_i32_0 = arith.constant 0 : i32
    %c0_i32_1 = arith.constant 0 : i32
    return %c0_i32, %c0_i32_0 : i32, i32
  }
  func.func @transform_2(%arg0: i32) -> (i32, i32) {
    %c0_i32 = arith.constant 0 : i32
    %c0_i32_0 = arith.constant 0 : i32
    %c0_i32_1 = arith.constant 0 : i32
    return %c0_i32, %c0_i32_0 : i32, i32
  }
  func.func @transform_3(%arg0: i32) -> (i32, i32) {
    %c0_i32 = arith.constant 0 : i32
    %c0_i32_0 = arith.constant 0 : i32
    %c0_i32_1 = arith.constant 0 : i32
    return %c0_i32, %c0_i32_0 : i32, i32
  }
  func.func @transform_4(%arg0: i32) -> (i32, i32) {
    %c0_i32 = arith.constant 0 : i32
    %c0_i32_0 = arith.constant 0 : i32
    %c0_i32_1 = arith.constant 0 : i32
    return %c0_i32, %c0_i32_0 : i32, i32
  }
  func.func @transform_5(%arg0: i32) -> (i32, i32) {
    %c0_i32 = arith.constant 0 : i32
    %c0_i32_0 = arith.constant 0 : i32
    %c0_i32_1 = arith.constant 0 : i32
    return %c0_i32, %c0_i32_0 : i32, i32
  }
  func.func @transform_6(%arg0: i32) -> (i32, i32) {
    %c0_i32 = arith.constant 0 : i32
    %c0_i32_0 = arith.constant 0 : i32
    %c0_i32_1 = arith.constant 0 : i32
    return %c0_i32, %c0_i32_0 : i32, i32
  }
  func.func @transform_7(%arg0: i32) -> (i32, i32) {
    %c0_i32 = arith.constant 0 : i32
    %c0_i32_0 = arith.constant 0 : i32
    return %arg0, %c0_i32 : i32, i32
  }
}

</mosaic_0001>

<bundles_post_ra>
// kernel: network_forward.1
= control target key start
LH: loop header
LB: loop body
LE: loop exit
PB: predicated region body
PF: predicated region fallthrough
CT: control target
= control target key end

     0   :  { %s1359_s24 = smov 0   ;;  %s1539_s0 = inlined_call_operand.vmem [shape: bf16[256,32], index: 0, kind: input, shape index: {}]   ;;  %s1540_s1 = inlined_call_operand.vmem [shape: bf16[32,64], index: 1, kind: input, shape index: {}]   ;;  %s1541_s2 = inlined_call_operand.vmem [shape: f32[1,64], index: 2, kind: input, shape index: {}]   ;;  %s1542_s3 = inlined_call_operand.vmem [shape: bf16[64,32], index: 3, kind: input, shape index: {}]   ;;  %s1543_s4 = inlined_call_operand.vmem [shape: f32[1,32], index: 4, kind: input, shape index: {}]   ;;  %s1544_s5 = inlined_call_operand.vmem [shape: bf16[32,128], index: 5, kind: input, shape index: {}]   ;;  %s1545_s6 = inlined_call_operand.vmem [shape: f32[1,128], index: 6, kind: input, shape index: {}]   ;;  %s1546_s7 = inlined_call_operand.vmem [shape: f32[256,128], index: 7, kind: output, shape index: {}]  }
   0x1 LB: > { %s1069_s25 = sadd.s32 4294967295, %s1317_s24   ;;  %p1073_p0 = scmp.ge.s32.totalorder %s1317_s24, 1  ;;  %s1317_s24 = sphi %s1359_s24, %s17_s24  }
   0x2   : > { %p238_p1 = scmp.lt.s32.totalorder %s1317_s24, 3 }
   0x4   : > { %p239_p2 = pnand %p1073_p0, %p238_p1 }
   0x5   : > { %s1074_s28 = sshll.u32 (!%p239_p2), %s1069_s25, 4 }
   0x6   : > { %242 = sbr.rel (%p239_p2) target bundleno = 974 (0x3ce), region = 48  ;;  %p271_p3 = scmp.lt.s32.totalorder (!%p239_p2), %s1074_s28, 31 }
   0xb   : > { %v1231_v0 = vld [vmem:[%s1540_s1 + $0x8] sm:$0xff]   ;;  %v1232_v1 = vld [vmem:[%s1540_s1] sm:$0xff]   ;;  %s1548_s28 = smov (!%p271_p3, %s1074_s28), 31  ;;  %v1241_v2 = vld [vmem:[%s1542_s3 + $0x18] sm:$0xff]   ;;  %vm362_vm0 = vcmask 261120   ;;  %vm547_vm1 = vcmask 523264  }
   0xc   : > { %1155 = vmatprep.subr.bf16.mxu0 %v1231_v0  ;;  %1219 = vmatprep.subr.bf16.mxu1 %v1231_v0  ;;  %s1075_s10 = sshll.u32 %s1548_s28, 2  ;;  %v1242_v11 = vld [vmem:[%s1542_s3 + $0x10] sm:$0xff]   ;;  %v1243_v12 = vld [vmem:[%s1542_s3 + $0x8] sm:$0xff]   ;;  %v1244_v13 = vld [vmem:[%s1542_s3] sm:$0xff]   ;;  %s1077_s9 = sshll.u32 %s1548_s28, 3 }
   0xd   : > { %1156 = vmatpush3.bf16.msra.mxu0 %v1231_v0  ;;  %1221 = vmatpush3.bf16.msra.mxu1 %v1231_v0  ;;  %s274_s13 = scalar_lea.vmem %s1539_s0, %s1075_s10  ;;  %v1245_v14 = vld [vmem:[%s1544_s5 + $0x8] sm:$0xff]   ;;  %v1078_v17 = vld [vmem:[%s1541_s2] ss:$0 sm:$0xff]  ;;  %s1502_s12 = scalar_lea.vmem %s1546_s7, %s1077_s9 }
   0xe   : > { %1157 = vmatprep.subr.bf16.mxu0 %v1232_v1  ;;  %1220 = vmatprep.subr.bf16.mxu1 %v1232_v1  ;;  %v1233_v3 = vld [vmem:[%s274_s13] sm:$0xff]   ;;  %v1234_v4 = vld [vmem:[%s274_s13 + $0x8] sm:$0xff]   ;;  %v1235_v5 = vld [vmem:[%s274_s13 + $0x10] sm:$0xff]  }
   0xf   : > { %1159 = vmatprep.mubr.msk.bf16.mxu0 %vm362_vm0, %v1233_v3  ;;  %v1237_v6 = vld [vmem:[%s274_s13 + $0x20] sm:$0xff]   ;;  %v1238_v7 = vld [vmem:[%s274_s13 + $0x28] sm:$0xff]   ;;  %v1239_v8 = vld [vmem:[%s274_s13 + $0x30] sm:$0xff]  }
  0x10   : > { %1167 = vmatprep.mubr.msk.bf16.mxu1 %vm362_vm0, %v1237_v6  ;;  %v1236_v9 = vld [vmem:[%s274_s13 + $0x18] sm:$0xff]  }
  0x11   : > { %1158 = vmatpush3.bf16.msra.mxu0 %v1232_v1  ;;  %1222 = vmatpush3.bf16.msra.mxu1 %v1232_v1  ;;  %v1240_v10 = vld [vmem:[%s274_s13 + $0x38] sm:$0xff]  }
  0x12   : > { %1175 = vmatprep.subr.bf16.mxu1 %v1241_v2  ;;  %1199 = vmatprep.subr.bf16.mxu0 %v1245_v14 }
  0x14   : > { %1160 = vmatmul.mubr.msk.bf16.vlgmr.msra.gmra.mxu0 %vm362_vm0, %v1234_v4  ;;  %1168 = vmatmul.mubr.msk.bf16.vlgmr.msra.gmra.mxu1 %vm362_vm0, %v1238_v7 }
  0x15   : > { %1163 = vmatprep.mubr.msk.bf16.mxu0 %vm362_vm0, %v1235_v5  ;;  %1171 = vmatprep.mubr.msk.bf16.mxu1 %vm362_vm0, %v1239_v8  ;;  %v1246_v8 = vld [vmem:[%s1544_s5] sm:$0xff]  }
  0x16   : > { %1176 = vmatpush3.bf16.msra.mxu1 %v1241_v2  ;;  %1200 = vmatpush3.bf16.msra.mxu0 %v1245_v14 }
  0x17   : > { %1177 = vmatprep.subr.bf16.mxu1 %v1242_v11  ;;  %1201 = vmatprep.subr.bf16.mxu0 %v1246_v8 }
  0x1a   : > { %1178 = vmatpush3.bf16.msra.mxu1 %v1242_v11  ;;  %1202 = vmatpush3.bf16.msra.mxu0 %v1246_v8  ;;  %v1097_v11 = vld [vmem:[%s1543_s4] ss:$0 sm:$0xff] }
  0x1b   : > { %1179 = vmatprep.subr.bf16.mxu1 %v1243_v12 }
  0x1c   : > { %1164 = vmatmul.mubr.msk.bf16.gmra.mxu0 %vm362_vm0, %v1236_v9  ;;  %1172 = vmatmul.mubr.msk.bf16.gmra.mxu1 %vm362_vm0, %v1240_v10 }
  0x1e   : > { %1180 = vmatpush3.bf16.msra.mxu1 %v1243_v12 }
  0x1f   : > { %1181 = vmatprep.subr.bf16.mxu1 %v1244_v13 }
  0x22   : > { %1182 = vmatpush3.bf16.msra.mxu1 %v1244_v13 }
  0xd4   : > { %v1161_v15 = vpop.f32.mrf.mxu0  ;;  %v1169_v19 = vpop.f32.mrf.mxu1 }
  0xd5   : > { %v430_v22 = vadd.f32 %v1161_v15, %v1078_v17  ;;  %v462_v58 = vadd.f32 %v1169_v19, %v1078_v17 }
  0xd6   : > { %v421_v16 = vpop.f32.mrf.mxu0  ;;  %v453_v24 = vpop.f32.mrf.mxu1 }
  0xd7   : > { %v422_v20 = vadd.f32 %v1078_v17, %v421_v16  ;;  %v486_v31 = vmax.f32 %v430_v22, 0.0  ;;  %v454_v35 = vadd.f32 %v1078_v17, %v453_v24  ;;  %v494_v63 = vmax.f32 %v462_v58, 0.0 }
  0xd8   : > { %v1162_v18 = vpop.f32.mrf.mxu0  ;;  %v1170_v28 = vpop.f32.mrf.mxu1 }
  0xd9   : > { %v433_v21 = vadd.f32 %v1162_v18, %v1078_v17  ;;  %v484_v29 = vmax.f32 %v422_v20, 0.0  ;;  %v492_v45 = vmax.f32 %v454_v35, 0.0  ;;  %v465_v60 = vadd.f32 %v1170_v28, %v1078_v17 }
  0xda   : > { %v424_v23 = vpop.f32.mrf.mxu0  ;;  %v456_v33 = vpop.f32.mrf.mxu1 }
  0xdb   : > { %v425_v25 = vadd.f32 %v1078_v17, %v424_v23  ;;  %v487_v26 = vmax.f32 %v433_v21, 0.0  ;;  %v457_v36 = vadd.f32 %v1078_v17, %v456_v33  ;;  %v495_v0 = vmax.f32 %v465_v60, 0.0 }
  0xdc   : > { %v1165_v27 = vpop.f32.mrf.mxu0  ;;  %v1173_v39 = vpop.f32.mrf.mxu1 }
  0xdd   : > { %v485_v30 = vmax.f32 %v425_v25, 0.0  ;;  %v501_v37 = vpack.c.bf16 %v487_v26, %v486_v31  ;;  %v446_v42 = vadd.f32 %v1165_v27, %v1078_v17  ;;  %v493_v47 = vmax.f32 %v457_v36, 0.0 }
  0xde   : > { %v437_v32 = vpop.f32.mrf.mxu0  ;;  %v469_v44 = vpop.f32.mrf.mxu1  ;;  %v505_v2 = vpack.c.bf16 %v495_v0, %v494_v63  ;;  %v478_v3 = vadd.f32 %v1173_v39, %v1078_v17 }
  0xdf   : > { %v500_v34 = vpack.c.bf16 %v485_v30, %v484_v29  ;;  %v438_v40 = vadd.f32 %v1078_v17, %v437_v32  ;;  %v490_v52 = vmax.f32 %v446_v42, 0.0  ;;  %v504_v55 = vpack.c.bf16 %v493_v47, %v492_v45 }
  0xe0   : > { %v1166_v38 = vpop.f32.mrf.mxu0  ;;  %v1174_v49 = vpop.f32.mrf.mxu1  ;;  %v470_v56 = vadd.f32 %v1078_v17, %v469_v44  ;;  %v498_v5 = vmax.f32 %v478_v3, 0.0 }
  0xe1   : > { %v449_v41 = vadd.f32 %v1166_v38, %v1078_v17  ;;  %1183 = vmatprep.mubr.msk.bf16.mxu1 %vm547_vm1, %v500_v34  ;;  %v488_v50 = vmax.f32 %v438_v40, 0.0  ;;  %v481_v4 = vadd.f32 %v1174_v49, %v1078_v17 }
  0xe2   : > { %v440_v43 = vpop.f32.mrf.mxu0  ;;  %1184 = vmatmul.mubr.msk.bf16.vlgmr.msra.gmra.mxu1 %vm547_vm1, %v501_v37  ;;  %v472_v53 = vpop.f32.mrf.mxu1  ;;  %v496_v61 = vmax.f32 %v470_v56, 0.0 }
  0xe3   : > { %v441_v46 = vadd.f32 %v1078_v17, %v440_v43  ;;  %v491_v48 = vmax.f32 %v449_v41, 0.0  ;;  %v473_v57 = vadd.f32 %v1078_v17, %v472_v53  ;;  %v499_v6 = vmax.f32 %v481_v4, 0.0 }
  0xe5   : > { %v489_v51 = vmax.f32 %v441_v46, 0.0  ;;  %v503_v59 = vpack.c.bf16 %v491_v48, %v490_v52  ;;  %v497_v62 = vmax.f32 %v473_v57, 0.0  ;;  %v507_v7 = vpack.c.bf16 %v499_v6, %v498_v5 }
  0xe7   : > { %v502_v54 = vpack.c.bf16 %v489_v51, %v488_v50  ;;  %v506_v1 = vpack.c.bf16 %v497_v62, %v496_v61 }
  0xe9   : > { %1187 = vmatprep.mubr.msk.bf16.mxu1 %vm547_vm1, %v502_v54 }
  0xea   : > { %1188 = vmatmul.mubr.msk.bf16.gmra.mxu1 %vm547_vm1, %v503_v59 }
  0xeb   : > { %1191 = vmatprep.mubr.msk.bf16.mxu1 %vm547_vm1, %v504_v55 }
  0xf2   : > { %1192 = vmatmul.mubr.msk.bf16.gmra.mxu1 %vm547_vm1, %v505_v2  ;;  %v1110_v2 = vld [vmem:[%s1545_s6] ss:$0 sm:$0xff] }
  0xf3   : > { %1195 = vmatprep.mubr.msk.bf16.mxu1 %vm547_vm1, %v506_v1 }
  0xfa   : > { %1196 = vmatmul.mubr.msk.bf16.gmra.mxu1 %vm547_vm1, %v507_v7 }
 0x1a2   : > { %v1185_v9 = vpop.f32.mrf.mxu1 }
 0x1a3   : > { %v615_v15 = vadd.f32 %v1185_v9, %v1097_v11 }
 0x1a4   : > { %v606_v10 = vpop.f32.mrf.mxu1 }
 0x1a5   : > { %v607_v13 = vadd.f32 %v1097_v11, %v606_v10  ;;  %v671_v22 = vmax.f32 %v615_v15, 0.0 }
 0x1a6   : > { %v1186_v12 = vpop.f32.mrf.mxu1 }
 0x1a7   : > { %v618_v14 = vadd.f32 %v1186_v12, %v1097_v11  ;;  %v669_v20 = vmax.f32 %v607_v13, 0.0 }
 0x1a8   : > { %v609_v16 = vpop.f32.mrf.mxu1 }
 0x1a9   : > { %v610_v17 = vadd.f32 %v1097_v11, %v609_v16  ;;  %v672_v18 = vmax.f32 %v618_v14, 0.0 }
 0x1aa   : > { %v1189_v19 = vpop.f32.mrf.mxu1 }
 0x1ab   : > { %v670_v21 = vmax.f32 %v610_v17, 0.0  ;;  %v686_v25 = vpack.c.bf16 %v672_v18, %v671_v22  ;;  %v631_v29 = vadd.f32 %v1189_v19, %v1097_v11 }
 0x1ac   : > { %v622_v23 = vpop.f32.mrf.mxu1 }
 0x1ad   : > { %v685_v24 = vpack.c.bf16 %v670_v21, %v669_v20  ;;  %v623_v27 = vadd.f32 %v1097_v11, %v622_v23  ;;  %v675_v36 = vmax.f32 %v631_v29, 0.0 }
 0x1ae   : > { %v1190_v26 = vpop.f32.mrf.mxu1 }
 0x1af   : > { %v634_v28 = vadd.f32 %v1190_v26, %v1097_v11  ;;  %1203 = vmatprep.mubr.msk.bf16.mxu0 %vm362_vm0, %v685_v24  ;;  %v673_v34 = vmax.f32 %v623_v27, 0.0 }
 0x1b0   : > { %v625_v30 = vpop.f32.mrf.mxu1  ;;  %1204 = vmatmul.mubr.msk.bf16.vlgmr.msra.gmra.mxu0 %vm362_vm0, %v686_v25 }
 0x1b1   : > { %v626_v31 = vadd.f32 %v1097_v11, %v625_v30  ;;  %v676_v32 = vmax.f32 %v634_v28, 0.0 }
 0x1b2   : > { %v1193_v33 = vpop.f32.mrf.mxu1 }
 0x1b3   : > { %v674_v35 = vmax.f32 %v626_v31, 0.0  ;;  %v688_v39 = vpack.c.bf16 %v676_v32, %v675_v36  ;;  %v647_v43 = vadd.f32 %v1193_v33, %v1097_v11 }
 0x1b4   : > { %v638_v37 = vpop.f32.mrf.mxu1 }
 0x1b5   : > { %v687_v38 = vpack.c.bf16 %v674_v35, %v673_v34  ;;  %v639_v41 = vadd.f32 %v1097_v11, %v638_v37  ;;  %v679_v50 = vmax.f32 %v647_v43, 0.0 }
 0x1b6   : > { %v1194_v40 = vpop.f32.mrf.mxu1 }
 0x1b7   : > { %v650_v42 = vadd.f32 %v1194_v40, %v1097_v11  ;;  %1207 = vmatprep.mubr.msk.bf16.mxu0 %vm362_vm0, %v687_v38  ;;  %v677_v48 = vmax.f32 %v639_v41, 0.0 }
 0x1b8   : > { %v641_v44 = vpop.f32.mrf.mxu1  ;;  %1208 = vmatmul.mubr.msk.bf16.gmra.mxu0 %vm362_vm0, %v688_v39 }
 0x1b9   : > { %v642_v45 = vadd.f32 %v1097_v11, %v641_v44  ;;  %v680_v46 = vmax.f32 %v650_v42, 0.0 }
 0x1ba   : > { %v1197_v47 = vpop.f32.mrf.mxu1 }
 0x1bb   : > { %v678_v49 = vmax.f32 %v642_v45, 0.0  ;;  %v690_v53 = vpack.c.bf16 %v680_v46, %v679_v50  ;;  %v663_v57 = vadd.f32 %v1197_v47, %v1097_v11 }
 0x1bc   : > { %v654_v51 = vpop.f32.mrf.mxu1 }
 0x1bd   : > { %v689_v52 = vpack.c.bf16 %v678_v49, %v677_v48  ;;  %v655_v55 = vadd.f32 %v1097_v11, %v654_v51  ;;  %v683_v63 = vmax.f32 %v663_v57, 0.0 }
 0x1be   : > { %v1198_v54 = vpop.f32.mrf.mxu1 }
 0x1bf   : > { %v666_v56 = vadd.f32 %v1198_v54, %v1097_v11  ;;  %1211 = vmatprep.mubr.msk.bf16.mxu0 %vm362_vm0, %v689_v52  ;;  %v681_v61 = vmax.f32 %v655_v55, 0.0 }
 0x1c0   : > { %v657_v58 = vpop.f32.mrf.mxu1  ;;  %1212 = vmatmul.mubr.msk.bf16.gmra.mxu0 %vm362_vm0, %v690_v53 }
 0x1c1   : > { %v658_v59 = vadd.f32 %v1097_v11, %v657_v58  ;;  %v684_v60 = vmax.f32 %v666_v56, 0.0 }
 0x1c3   : > { %v682_v62 = vmax.f32 %v658_v59, 0.0  ;;  %v692_v1 = vpack.c.bf16 %v684_v60, %v683_v63 }
 0x1c5   : > { %v691_v0 = vpack.c.bf16 %v682_v62, %v681_v61 }
 0x1c7   : > { %1215 = vmatprep.mubr.msk.bf16.mxu0 %vm362_vm0, %v691_v0 }
 0x1c8   : > { %1216 = vmatmul.mubr.msk.bf16.gmra.mxu0 %vm362_vm0, %v692_v1 }
 0x270   : > { %v1205_v3 = vpop.f32.mrf.mxu0 }
 0x271   : > { %v783_v4 = vadd.f32 %v1205_v3, %v1110_v2 }
 0x272   : > { %v774_v5 = vpop.f32.mrf.mxu0 }
 0x273   : > { %v775_v6 = vadd.f32 %v1110_v2, %v774_v5  ;;  %841 = vmax.xlane.f32.xlu1 %v783_v4 }
 0x274   : > { %v1206_v7 = vpop.f32.mrf.mxu0 }
 0x275   : > { %v786_v8 = vadd.f32 %v1206_v7, %v1110_v2  ;;  %837 = vmax.xlane.f32.xlu0 %v775_v6 }
 0x276   : > { %v777_v9 = vpop.f32.mrf.mxu0 }
 0x277   : > { %v778_v10 = vadd.f32 %v1110_v2, %v777_v9  ;;  %843 = vmax.xlane.f32.xlu1 %v786_v8 }
 0x278   : > { %v1209_v11 = vpop.f32.mrf.mxu0 }
 0x279   : > { %839 = vmax.xlane.f32.xlu0 %v778_v10  ;;  %v799_v13 = vadd.f32 %v1209_v11, %v1110_v2 }
 0x27a   : > { %v790_v12 = vpop.f32.mrf.mxu0 }
 0x27b   : > { %v791_v17 = vadd.f32 %v1110_v2, %v790_v12 }
 0x27c   : > { %v1210_v14 = vpop.f32.mrf.mxu0 }
 0x27d   : > { %v802_v15 = vadd.f32 %v1210_v14, %v1110_v2  ;;  %849 = vmax.xlane.f32.xlu0 %v799_v13 }
 0x27e   : > { %v793_v16 = vpop.f32.mrf.mxu0 }
 0x27f   : > { %851 = vmax.xlane.f32.xlu1 %v802_v15  ;;  %v794_v19 = vadd.f32 %v1110_v2, %v793_v16 }
 0x280   : > { %v1213_v18 = vpop.f32.mrf.mxu0 }
 0x281   : > { %845 = vmax.xlane.f32.xlu0 %v791_v17  ;;  %v815_v21 = vadd.f32 %v1213_v18, %v1110_v2 }
 0x282   : > { %v806_v20 = vpop.f32.mrf.mxu0 }
 0x283   : > { %847 = vmax.xlane.f32.xlu1 %v794_v19  ;;  %v807_v25 = vadd.f32 %v1110_v2, %v806_v20 }
 0x284   : > { %v1214_v22 = vpop.f32.mrf.mxu0 }
 0x285   : > { %v818_v23 = vadd.f32 %v1214_v22, %v1110_v2  ;;  %857 = vmax.xlane.f32.xlu0 %v815_v21 }
 0x286   : > { %v809_v24 = vpop.f32.mrf.mxu0 }
 0x287   : > { %859 = vmax.xlane.f32.xlu1 %v818_v23  ;;  %v1430_v27 = vadd.f32 %v1110_v2, %v809_v24 }
 0x288   : > { %v1217_v26 = vpop.f32.mrf.mxu0 }
 0x289   : > { %853 = vmax.xlane.f32.xlu0 %v807_v25  ;;  %v1436_v32 = vadd.f32 %v1217_v26, %v1110_v2 }
 0x28a   : > { %v822_v28 = vpop.f32.mrf.mxu0 }
 0x28b   : > { %v1432_v29 = vadd.f32 %v1110_v2, %v822_v28  ;;  %855 = vmax.xlane.f32.xlu1 %v1430_v27 }
 0x28c   : > { %v1218_v30 = vpop.f32.mrf.mxu0 }
 0x28d   : > { %861 = vmax.xlane.f32.xlu0 %v1432_v29  ;;  %v1442_v34 = vadd.f32 %v1218_v30, %v1110_v2 }
 0x28e   : > { %v825_v31 = vpop.f32.mrf.mxu0 }
 0x28f   : > { %v1438_v33 = vadd.f32 %v1110_v2, %v825_v31 }
 0x291   : > { %863 = vmax.xlane.f32.xlu1 %v1438_v33  ;;  %865 = vmax.xlane.f32.xlu0 %v1436_v32 }
 0x295   : > { %867 = vmax.xlane.f32.xlu1 %v1442_v34 }
 0x2fc   : > { %v842_v35 = vpop.xlane.xlu1 %841 }
 0x2fd   : > { %v1445_v36 = vsub.f32 %v783_v4, %v842_v35 }
 0x2fe   : > { %v838_v37 = vpop.xlane.xlu0 %837 }
 0x2ff   : > { %v889_v38 = vmul.f32 1.442695, %v1445_v36  ;;  %v1448_v39 = vsub.f32 %v775_v6, %v838_v37 }
 0x300   : > { %v844_v40 = vpop.xlane.xlu1 %843 }
 0x301   : > { %1247 = vpow2.f32 %v889_v38  ;;  %v885_v41 = vmul.f32 1.442695, %v1448_v39  ;;  %v1451_v42 = vsub.f32 %v786_v8, %v844_v40 }
 0x302   : > { %v840_v43 = vpop.xlane.xlu0 %839 }
 0x303   : > { %v891_v44 = vmul.f32 1.442695, %v1451_v42  ;;  %v1454_v45 = vsub.f32 %v778_v10, %v840_v43  ;;  %1249 = vpow2.f32 %v885_v41 }
 0x305   : > { %1251 = vpow2.f32 %v891_v44  ;;  %v887_v46 = vmul.f32 1.442695, %v1454_v45 }
 0x306   : > { %v850_v47 = vpop.xlane.xlu0 %849 }
 0x307   : > { %v1457_v48 = vsub.f32 %v799_v13, %v850_v47  ;;  %1253 = vpow2.f32 %v887_v46 }
 0x308   : > { %v852_v49 = vpop.xlane.xlu1 %851 }
 0x309   : > { %v897_v50 = vmul.f32 1.442695, %v1457_v48  ;;  %v1460_v51 = vsub.f32 %v802_v15, %v852_v49 }
 0x30a   : > { %v846_v52 = vpop.xlane.xlu0 %845 }
 0x30b   : > { %1255 = vpow2.f32 %v897_v50  ;;  %v899_v53 = vmul.f32 1.442695, %v1460_v51  ;;  %v1463_v54 = vsub.f32 %v791_v17, %v846_v52 }
 0x30c   : > { %v848_v55 = vpop.xlane.xlu1 %847 }
 0x30d   : > { %1257 = vpow2.f32 %v899_v53  ;;  %v893_v56 = vmul.f32 1.442695, %v1463_v54  ;;  %v1466_v57 = vsub.f32 %v794_v19, %v848_v55 }
 0x30e   : > { %v1248_v58 = vpop.eup %1247  ;;  %v858_v59 = vpop.xlane.xlu0 %857 }
 0x30f   : > { %1259 = vpow2.f32 %v893_v56  ;;  %v895_v60 = vmul.f32 1.442695, %v1466_v57  ;;  %v1469_v61 = vsub.f32 %v815_v21, %v858_v59  ;;  %921 = vadd.xlane.f32.xlu0 %v1248_v58 }
 0x310   : > { %v860_v62 = vpop.xlane.xlu1 %859  ;;  %v1250_v63 = vpop.eup %1249 }
 0x311   : > { %1261 = vpow2.f32 %v895_v60  ;;  %v905_v0 = vmul.f32 1.442695, %v1469_v61  ;;  %v1472_v1 = vsub.f32 %v818_v23, %v860_v62 }
 0x312   : > { %v1252_v2 = vpop.eup %1251  ;;  %v854_v3 = vpop.xlane.xlu0 %853 }
 0x313   : > { %1263 = vpow2.f32 %v905_v0  ;;  %v907_v4 = vmul.f32 1.442695, %v1472_v1  ;;  %v1475_v5 = vsub.f32 %v807_v25, %v854_v3  ;;  %923 = vadd.xlane.f32.xlu1 %v1252_v2  ;;  %917 = vadd.xlane.f32.xlu0 %v1250_v63 }
 0x314   : > { %v856_v6 = vpop.xlane.xlu1 %855  ;;  %v1254_v9 = vpop.eup %1253 }
 0x315   : > { %1265 = vpow2.f32 %v907_v4  ;;  %v901_v7 = vmul.f32 1.442695, %v1475_v5  ;;  %v1479_v8 = vsub.f32 %v1430_v27, %v856_v6 }
 0x316   : > { %v862_v10 = vpop.xlane.xlu0 %861 }
 0x317   : > { %1267 = vpow2.f32 %v901_v7  ;;  %v903_v11 = vmul.f32 1.442695, %v1479_v8  ;;  %v1483_v12 = vsub.f32 %v1432_v29, %v862_v10  ;;  %919 = vadd.xlane.f32.xlu1 %v1254_v9 }
 0x318   : > { %v1256_v13 = vpop.eup %1255 }
 0x319   : > { %1269 = vpow2.f32 %v903_v11  ;;  %v909_v14 = vmul.f32 1.442695, %v1483_v12  ;;  %929 = vadd.xlane.f32.xlu0 %v1256_v13 }
 0x31a   : > { %v1258_v15 = vpop.eup %1257  ;;  %v864_v16 = vpop.xlane.xlu1 %863 }
 0x31b   : > { %v866_v17 = vpop.xlane.xlu0 %865  ;;  %1271 = vpow2.f32 %v909_v14  ;;  %v1487_v18 = vsub.f32 %v1438_v33, %v864_v16  ;;  %931 = vadd.xlane.f32.xlu1 %v1258_v15 }
 0x31c   : > { %v1490_v19 = vsub.f32 %v1436_v32, %v866_v17  ;;  %v1260_v20 = vpop.eup %1259 }
 0x31d   : > { %v911_v21 = vmul.f32 1.442695, %v1487_v18  ;;  %925 = vadd.xlane.f32.xlu0 %v1260_v20 }
 0x31e   : > { %v913_v22 = vmul.f32 1.442695, %v1490_v19  ;;  %v1262_v23 = vpop.eup %1261  ;;  %v868_v24 = vpop.xlane.xlu1 %867 }
 0x31f   : > { %1273 = vpow2.f32 %v911_v21  ;;  %v1495_v25 = vsub.f32 %v1442_v34, %v868_v24  ;;  %927 = vadd.xlane.f32.xlu1 %v1262_v23 }
 0x320   : > { %v1264_v26 = vpop.eup %1263  ;;  %1275 = vpow2.f32 %v913_v22 }
 0x321   : > { %v915_v27 = vmul.f32 1.442695, %v1495_v25  ;;  %937 = vadd.xlane.f32.xlu0 %v1264_v26 }
 0x322   : > { %v1266_v28 = vpop.eup %1265 }
 0x323   : > { %1277 = vpow2.f32 %v915_v27  ;;  %939 = vadd.xlane.f32.xlu1 %v1266_v28 }
 0x324   : > { %v1268_v29 = vpop.eup %1267 }
 0x325   : > { %933 = vadd.xlane.f32.xlu0 %v1268_v29 }
 0x326   : > { %v1270_v30 = vpop.eup %1269 }
 0x327   : > { %935 = vadd.xlane.f32.xlu1 %v1270_v30 }
 0x328   : > { %v1272_v31 = vpop.eup %1271 }
 0x329   : > { %941 = vadd.xlane.f32.xlu0 %v1272_v31 }
 0x32c   : > { %v1274_v32 = vpop.eup %1273 }
 0x32d   : > { %v1276_v33 = vpop.eup %1275  ;;  %943 = vadd.xlane.f32.xlu1 %v1274_v32 }
 0x32e   : > { %945 = vadd.xlane.f32.xlu0 %v1276_v33 }
 0x330   : > { %v1278_v34 = vpop.eup %1277 }
 0x331   : > { %947 = vadd.xlane.f32.xlu1 %v1278_v34 }
 0x398   : > { %v922_v35 = vpop.xlane.xlu0 %921 }
 0x399   : > { %1279 = vlog2.f32 %v922_v35 }
 0x39c   : > { %v924_v37 = vpop.xlane.xlu1 %923  ;;  %v918_v38 = vpop.xlane.xlu0 %917 }
 0x39d   : > { %1281 = vlog2.f32 %v924_v37 }
 0x39e   : > { %1283 = vlog2.f32 %v918_v38 }
 0x3a0   : > { %v920_v40 = vpop.xlane.xlu1 %919 }
 0x3a1   : > { %1285 = vlog2.f32 %v920_v40 }
 0x3a2   : > { %v930_v41 = vpop.xlane.xlu0 %929 }
 0x3a3   : > { %1287 = vlog2.f32 %v930_v41 }
 0x3a4   : > { %v932_v43 = vpop.xlane.xlu1 %931 }
 0x3a5   : > { %1289 = vlog2.f32 %v932_v43 }
 0x3a6   : > { %v1280_v44 = vpop.eup %1279  ;;  %v926_v46 = vpop.xlane.xlu0 %925 }
 0x3a7   : > { %v954_v47 = vmul.f32 0.6931472, %v1280_v44  ;;  %1291 = vlog2.f32 %v926_v46 }
 0x3a8   : > { %v928_v49 = vpop.xlane.xlu1 %927 }
 0x3a9   : > { %v983_v50 = vsub.f32 %v1445_v36, %v954_v47  ;;  %1293 = vlog2.f32 %v928_v49 }
 0x3aa   : > { %v1282_v52 = vpop.eup %1281  ;;  %v938_v53 = vpop.xlane.xlu0 %937 }
 0x3ab   : > { %v1284_v55 = vpop.eup %1283  ;;  %999 = vst [vmem:[%s1502_s12 + $0x10] sm:$0xff] %v983_v50  ;;  %v956_v56 = vmul.f32 0.6931472, %v1282_v52  ;;  %1295 = vlog2.f32 %v938_v53 }
 0x3ac   : > { %v950_v58 = vmul.f32 0.6931472, %v1284_v55  ;;  %v940_v59 = vpop.xlane.xlu1 %939 }
 0x3ad   : > { %v984_v60 = vsub.f32 %v1451_v42, %v956_v56  ;;  %1297 = vlog2.f32 %v940_v59 }
 0x3ae   : > { %v1286_v62 = vpop.eup %1285  ;;  %v981_v63 = vsub.f32 %v1448_v39, %v950_v58  ;;  %v934_v0 = vpop.xlane.xlu0 %933 }
 0x3af   : > { %1000 = vst [vmem:[%s1502_s12 + $0x18] sm:$0xff] %v984_v60  ;;  %v952_v36 = vmul.f32 0.6931472, %v1286_v62  ;;  %1299 = vlog2.f32 %v934_v0 }
 0x3b0   : > { %v1288_v2 = vpop.eup %1287  ;;  %997 = vst [vmem:[%s1502_s12] sm:$0xff] %v981_v63  ;;  %v936_v3 = vpop.xlane.xlu1 %935 }
 0x3b1   : > { %v982_v4 = vsub.f32 %v1454_v45, %v952_v36  ;;  %v962_v6 = vmul.f32 0.6931472, %v1288_v2  ;;  %1301 = vlog2.f32 %v936_v3 }
 0x3b2   : > { %v1290_v7 = vpop.eup %1289  ;;  %v942_v42 = vpop.xlane.xlu0 %941 }
 0x3b3   : > { %998 = vst [vmem:[%s1502_s12 + $0x8] sm:$0xff] %v982_v4  ;;  %v987_v9 = vsub.f32 %v1457_v48, %v962_v6  ;;  %v964_v39 = vmul.f32 0.6931472, %v1290_v7  ;;  %1303 = vlog2.f32 %v942_v42 }
 0x3b4   : > { %v1292_v10 = vpop.eup %1291 }
 0x3b5   : > { %1003 = vst [vmem:[%s1502_s12 + $0x30] sm:$0xff] %v987_v9  ;;  %v988_v11 = vsub.f32 %v1460_v51, %v964_v39  ;;  %v958_v13 = vmul.f32 0.6931472, %v1292_v10 }
 0x3b6   : > { %v1294_v14 = vpop.eup %1293  ;;  %v944_v15 = vpop.xlane.xlu1 %943 }
 0x3b7   : > { %1004 = vst [vmem:[%s1502_s12 + $0x38] sm:$0xff] %v988_v11  ;;  %v985_v45 = vsub.f32 %v1463_v54, %v958_v13  ;;  %v960_v16 = vmul.f32 0.6931472, %v1294_v14  ;;  %1305 = vlog2.f32 %v944_v15  ;;  %v946_v17 = vpop.xlane.xlu0 %945 }
 0x3b8   : > { %v1296_v20 = vpop.eup %1295  ;;  %1307 = vlog2.f32 %v946_v17 }
 0x3b9   : > { %1001 = vst [vmem:[%s1502_s12 + $0x20] sm:$0xff] %v985_v45  ;;  %v986_v48 = vsub.f32 %v1466_v57, %v960_v16  ;;  %v970_v21 = vmul.f32 0.6931472, %v1296_v20 }
 0x3ba   : > { %v1298_v51 = vpop.eup %1297  ;;  %v948_v22 = vpop.xlane.xlu1 %947 }
 0x3bb   : > { %1002 = vst [vmem:[%s1502_s12 + $0x28] sm:$0xff] %v986_v48  ;;  %v991_v23 = vsub.f32 %v1469_v61, %v970_v21  ;;  %v972_v24 = vmul.f32 0.6931472, %v1298_v51  ;;  %1309 = vlog2.f32 %v948_v22 }
 0x3bc   : > { %v1300_v54 = vpop.eup %1299 }
 0x3bd   : > { %1007 = vst [vmem:[%s1502_s12 + $0x50] sm:$0xff] %v991_v23  ;;  %v992_v26 = vsub.f32 %v1472_v1, %v972_v24  ;;  %v966_v27 = vmul.f32 0.6931472, %v1300_v54 }
 0x3be   : > { %v1302_v28 = vpop.eup %1301 }
 0x3bf   : > { %1008 = vst [vmem:[%s1502_s12 + $0x58] sm:$0xff] %v992_v26  ;;  %v989_v57 = vsub.f32 %v1475_v5, %v966_v27  ;;  %v968_v29 = vmul.f32 0.6931472, %v1302_v28 }
 0x3c0   : > { %v1304_v30 = vpop.eup %1303 }
 0x3c1   : > { %1005 = vst [vmem:[%s1502_s12 + $0x40] sm:$0xff] %v989_v57  ;;  %v990_v31 = vsub.f32 %v1479_v8, %v968_v29  ;;  %v974_v61 = vmul.f32 0.6931472, %v1304_v30 }
 0x3c3   : > { %1006 = vst [vmem:[%s1502_s12 + $0x48] sm:$0xff] %v990_v31  ;;  %v993_v32 = vsub.f32 %v1483_v12, %v974_v61 }
 0x3c4   : > { %v1306_v33 = vpop.eup %1305 }
 0x3c5   : > { %v1308_v34 = vpop.eup %1307  ;;  %1009 = vst [vmem:[%s1502_s12 + $0x60] sm:$0xff] %v993_v32  ;;  %v976_v1 = vmul.f32 0.6931472, %v1306_v33 }
 0x3c6   : > { %v978_v35 = vmul.f32 0.6931472, %v1308_v34 }
 0x3c7   : > { %v994_v37 = vsub.f32 %v1487_v18, %v976_v1 }
 0x3c8   : > { %v1310_v5 = vpop.eup %1309  ;;  %v995_v38 = vsub.f32 %v1490_v19, %v978_v35 }
 0x3c9   : > { %1010 = vst [vmem:[%s1502_s12 + $0x68] sm:$0xff] %v994_v37  ;;  %v980_v40 = vmul.f32 0.6931472, %v1310_v5 }
 0x3ca   : > { %1011 = vst [vmem:[%s1502_s12 + $0x70] sm:$0xff] %v995_v38 }
 0x3cb   : > { %v996_v8 = vsub.f32 %v1495_v25, %v980_v40 }
 0x3cd   : > { %1012 = vst [vmem:[%s1502_s12 + $0x78] sm:$0xff] %v996_v8 }
 0x3ce PF: > { %s17_s24 = sadd.s32 1, %s1317_s24  }
 0x3cf   : > { %p14_p4 = scmp.ge.s32.totalorder %s17_s24, 4  }
 0x3d1   :  { %16 = sbr.rel (!%p14_p4) target bundleno = 1 (0x1), region = 78 }

</bundles_post_ra>
